<compile_context>
chip_gen: v6e
topology: v6e:2x2x1
jax: 0.10.0
libtpu: 0.0.40
codegen_flags: <defaults>
</compile_context>

<pallas_src>
import jax
import jax.numpy as jnp
from jax.experimental import pallas as pl
from jax.experimental.pallas import tpu as pltpu

LANE = 128


def _round_up(n: int, m: int) -> int:
    return ((n + m - 1) // m) * m


def _sublane_pack(dtype) -> int:
    # Native sublane packing: 8 rows for 4-byte dtypes, 16 for 2-byte, 32 for 1-byte.
    return max(8, 32 // jnp.dtype(dtype).itemsize)


def _channel_encoder_kernel(x_ref, w1_ref, b1_ref, w2_ref, b2_ref, o_ref):
    # x_ref : (TM, in_p)
    # w1_ref: (in_p, hid_p)       b1_ref: (1, hid_p)
    # w2_ref: (hid_p, out_dim)    b2_ref: (1, out_dim)
    # o_ref : (TM, out_dim)
    x = x_ref[...]

    # Linear 1 (MXU, f32 accumulate) + bias + ReLU (VPU, f32).
    h = jnp.dot(x, w1_ref[...], preferred_element_type=jnp.float32)
    h = jnp.maximum(h + b1_ref[...].astype(jnp.float32), 0.0)

    # Linear 2 (MXU, f32 accumulate) + bias.  Hidden is cast back to the input
    # dtype (matches PyTorch, which keeps activations in the input dtype);
    # no-op when everything is f32.
    y = jnp.dot(h.astype(x.dtype), w2_ref[...],
                preferred_element_type=jnp.float32)
    y = y + b2_ref[...].astype(jnp.float32)

    o_ref[...] = y.astype(o_ref.dtype)


def prepare_channel_encoder_params(w1, b1, w2, b2):
    """Pad / lay out the ChannelEncoder weights ONCE (cache across forwards).

    Expects JAX-layout weights: w1 [input_dim, hidden_dim], w2 [hidden_dim,
    output_dim] (PyTorch nn.Linear weights already transposed).  Only the
    input/hidden feature axes are lane-padded; the output feature axis keeps
    its true size so the kernel's output store needs no trailing slice.
    """
    input_dim, hidden_dim = w1.shape
    output_dim = w2.shape[1]
    in_p = _round_up(input_dim, LANE)
    hid_p = _round_up(hidden_dim, LANE)

    w1_p = jnp.pad(w1, ((0, in_p - input_dim), (0, hid_p - hidden_dim)))
    b1_p = jnp.pad(b1, (0, hid_p - hidden_dim)).reshape(1, hid_p)
    w2_p = jnp.pad(w2, ((0, hid_p - hidden_dim), (0, 0)))  # pad K only
    b2_p = b2.reshape(1, output_dim)
    return {"w1": w1_p, "b1": b1_p, "w2": w2_p, "b2": b2_p,
            "input_dim": input_dim}


def channel_encoder_forward(x, params, *, tm=None):
    """Fused MLP forward: relu(x @ w1 + b1) @ w2 + b2, x: [B, input_dim]."""
    w1_p, b1_p = params["w1"], params["b1"]
    w2_p, b2_p = params["w2"], params["b2"]
    B, input_dim = x.shape
    assert input_dim == params["input_dim"]
    in_p, hid_p = w1_p.shape
    out_dim = w2_p.shape[1]

    itemsize = jnp.dtype(x.dtype).itemsize
    sublane = _sublane_pack(x.dtype)

    # Feature-axis (K) padding of x only; batch is NOT padded (the partial
    # trailing block's stores are masked and MLP rows are independent).
    if in_p != input_dim:
        x = jnp.pad(x, ((0, 0), (0, in_p - input_dim)))

    # ---- batch tiling: large, balanced tiles ------------------------------
    if tm is None:
        tm = 2048 if in_p <= 512 else (1024 if in_p <= 1024 else 512)
    tm = max(sublane, tm)
    num_tiles = max(1, pl.cdiv(B, tm))
    if num_tiles == 1 and B >= 2 * sublane:
        num_tiles = 2                                  # feed both v7x TensorCores
    TM = _round_up(pl.cdiv(B, num_tiles), sublane)     # balanced (no tiny tail)
    TM = min(TM, _round_up(B, sublane))

    # ---- VMEM budget (portable: v5e 16 MiB default, v7x 64 MiB physical) ---
    def _vmem_need(tm_):
        act = 2 * tm_ * in_p * itemsize                # x tiles, double-buffered
        out = 2 * tm_ * out_dim * itemsize             # out tiles, double-buffered
        wts = (in_p * hid_p + hid_p + hid_p * out_dim + out_dim) * itemsize
        interm = tm_ * (hid_p + out_dim) * 4           # f32 intermediates (rough)
        return act + out + wts + interm

    VMEM_BUDGET = 24 * 1024 * 1024
    while TM > sublane and _vmem_need(TM) > VMEM_BUDGET:
        TM = max(sublane, _round_up(TM // 2, sublane))
    # TODO(synk): if the weights alone blow the budget (very large hidden_dim),
    # add a hidden/output tiling grid axis with a pl.when-initialized f32
    # accumulator instead of keeping both full weight matrices VMEM-resident.
    num_tiles = pl.cdiv(B, TM)

    cost = pl.CostEstimate(
        flops=2 * B * (in_p * hid_p + hid_p * out_dim),
        transcendentals=0,
        bytes_accessed=(
            B * in_p * itemsize                                    # x read
            + B * out_dim * itemsize                               # out write
            + (in_p * hid_p + hid_p + hid_p * out_dim + out_dim) * itemsize
        ),
    )

    # Constant-index weights/biases are DMA'd once; single-buffer them to
    # halve their resident VMEM footprint (matters most on v7x's 64 MiB VMEM).
    resident = pl.Buffered(1)

    return pl.pallas_call(
        _channel_encoder_kernel,
        out_shape=jax.ShapeDtypeStruct((B, out_dim), x.dtype),
        grid_spec=pl.GridSpec(
            grid=(num_tiles,),
            in_specs=[
                # Activations: batch-tiled, double-buffered by the pipeline.
                pl.BlockSpec((TM, in_p), lambda i: (i, 0)),
                # Weights & biases: VMEM-resident, single-buffered.
                pl.BlockSpec((in_p, hid_p), lambda i: (0, 0), pipeline_mode=resident),
                pl.BlockSpec((1, hid_p), lambda i: (0, 0), pipeline_mode=resident),
                pl.BlockSpec((hid_p, out_dim), lambda i: (0, 0), pipeline_mode=resident),
                pl.BlockSpec((1, out_dim), lambda i: (0, 0), pipeline_mode=resident),
            ],
            out_specs=pl.BlockSpec((TM, out_dim), lambda i: (i, 0)),
        ),
        compiler_params=pltpu.CompilerParams(
            dimension_semantics=("parallel",),      # megacore-shard batch tiles
            vmem_limit_bytes=32 * 1024 * 1024,      # v5e default is only 16 MiB
        ),
        cost_estimate=cost,
    )(x, w1_p, b1_p, w2_p, b2_p)


def _reference(x, w1, b1, w2, b2):
    h = jnp.maximum(x @ w1 + b1, 0.0)
    return h @ w2 + b2


if __name__ == "__main__":
    # Small, module-consistent shapes.
    batch = 8
    input_dim = 32
    hidden_dim = 64
    output_dim = 16

    key = jax.random.PRNGKey(0)
    kx, kw1, kb1, kw2, kb2, kx2 = jax.random.split(key, 6)

    x = jax.random.normal(kx, (batch, input_dim), dtype=jnp.float32)

    # Deterministic "nn.Linear-like" init (uniform in +-1/sqrt(fan_in)).
    lim1 = 1.0 / (input_dim ** 0.5)
    lim2 = 1.0 / (hidden_dim ** 0.5)
    # PyTorch stores W as [out, in]; build [out, in] then transpose -> [in, out].
    w1_pt = jax.random.uniform(kw1, (hidden_dim, input_dim),
                               minval=-lim1, maxval=lim1, dtype=jnp.float32)
    b1 = jax.random.uniform(kb1, (hidden_dim,),
                            minval=-lim1, maxval=lim1, dtype=jnp.float32)
    w2_pt = jax.random.uniform(kw2, (output_dim, hidden_dim),
                               minval=-lim2, maxval=lim2, dtype=jnp.float32)
    b2 = jax.random.uniform(kb2, (output_dim,),
                            minval=-lim2, maxval=lim2, dtype=jnp.float32)

    w1 = w1_pt.T  # [input_dim, hidden_dim]
    w2 = w2_pt.T  # [hidden_dim, output_dim]

    # Prepare (pad/layout) weights ONCE; reuse across forward calls.
    params = prepare_channel_encoder_params(w1, b1, w2, b2)

    out = jax.block_until_ready(channel_encoder_forward(x, params))
    ref = _reference(x, w1, b1, w2, b2)
    assert out.shape == (batch, output_dim)
    assert jnp.allclose(out, ref, atol=1e-5, rtol=1e-5), "mismatch vs JAX reference"

    # Ragged batch: exercises balanced multi-tile grid + masked trailing block
    # (no batch padding, no output slice).
    x2 = jax.random.normal(kx2, (40, input_dim), dtype=jnp.float32)
    out2 = jax.block_until_ready(channel_encoder_forward(x2, params))
    ref2 = _reference(x2, w1, b1, w2, b2)
    assert out2.shape == (40, output_dim)
    assert jnp.allclose(out2, ref2, atol=1e-5, rtol=1e-5), "mismatch (ragged batch)"

    print("KERNEL_OK")
</pallas_src>

<mosaic_0001>
module attributes {stable_mosaic.version = 11 : i64} {
  func.func @_channel_encoder_kernel(%arg0: i32, %arg1: memref<8x128xf32, #tpu.memory_space<vmem>>, %arg2: memref<128x128xf32, #tpu.memory_space<vmem>>, %arg3: memref<1x128xf32, #tpu.memory_space<vmem>>, %arg4: memref<128x16xf32, #tpu.memory_space<vmem>>, %arg5: memref<1x16xf32, #tpu.memory_space<vmem>>, %arg6: memref<8x16xf32, #tpu.memory_space<vmem>>) attributes {dimension_semantics = [#tpu.dimension_semantics<parallel>], iteration_bounds = array<i64: 1>, scalar_prefetch = 0 : i64, scratch_operands = 0 : i64, tpu.core_type = #tpu.core_type<tc>, window_params = [{transform_indices = @transform_0, window_bounds = array<i64: 8, 128>}, {pipeline_mode = #tpu.pipeline_mode<synchronous>, transform_indices = @transform_1, window_bounds = array<i64: 128, 128>}, {pipeline_mode = #tpu.pipeline_mode<synchronous>, transform_indices = @transform_2, window_bounds = array<i64: 1, 128>}, {pipeline_mode = #tpu.pipeline_mode<synchronous>, transform_indices = @transform_3, window_bounds = array<i64: 128, 16>}, {pipeline_mode = #tpu.pipeline_mode<synchronous>, transform_indices = @transform_4, window_bounds = array<i64: 1, 16>}, {transform_indices = @transform_5, window_bounds = array<i64: 8, 16>}]} {
    %c0 = arith.constant 0 : index
    %c0_0 = arith.constant 0 : index
    %0 = vector.load %arg1[%c0, %c0_0] : memref<8x128xf32, #tpu.memory_space<vmem>>, vector<8x128xf32>
    %c0_1 = arith.constant 0 : index
    %c0_2 = arith.constant 0 : index
    %1 = vector.load %arg2[%c0_1, %c0_2] : memref<128x128xf32, #tpu.memory_space<vmem>>, vector<128x128xf32>
    %cst = arith.constant dense<0.000000e+00> : vector<8x128xf32>
    %2 = tpu.matmul %0, %1, %cst {dimension_numbers = #tpu.dot_dimension_numbers<[1], [0], [0], [1], [0, 0, 1, 1], [], []>} : vector<8x128xf32>, vector<128x128xf32>, vector<8x128xf32> -> vector<8x128xf32>
    %c0_3 = arith.constant 0 : index
    %c0_4 = arith.constant 0 : index
    %3 = vector.load %arg3[%c0_3, %c0_4] : memref<1x128xf32, #tpu.memory_space<vmem>>, vector<1x128xf32>
    %4 = vector.broadcast %3 : vector<1x128xf32> to vector<8x128xf32>
    %5 = arith.addf %2, %4 : vector<8x128xf32>
    %cst_5 = arith.constant 0.000000e+00 : f32
    %6 = vector.broadcast %cst_5 : f32 to vector<8x128xf32>
    %7 = arith.maximumf %5, %6 : vector<8x128xf32>
    %c0_6 = arith.constant 0 : index
    %c0_7 = arith.constant 0 : index
    %8 = vector.load %arg4[%c0_6, %c0_7] : memref<128x16xf32, #tpu.memory_space<vmem>>, vector<128x16xf32>
    %cst_8 = arith.constant dense<0.000000e+00> : vector<8x16xf32>
    %9 = tpu.matmul %7, %8, %cst_8 {dimension_numbers = #tpu.dot_dimension_numbers<[1], [0], [0], [1], [0, 0, 1, 1], [], []>} : vector<8x128xf32>, vector<128x16xf32>, vector<8x16xf32> -> vector<8x16xf32>
    %c0_9 = arith.constant 0 : index
    %c0_10 = arith.constant 0 : index
    %10 = vector.load %arg5[%c0_9, %c0_10] : memref<1x16xf32, #tpu.memory_space<vmem>>, vector<1x16xf32>
    %11 = vector.broadcast %10 : vector<1x16xf32> to vector<8x16xf32>
    %12 = arith.addf %9, %11 : vector<8x16xf32>
    %c0_11 = arith.constant 0 : index
    %c0_12 = arith.constant 0 : index
    %13 = vector.load %arg6[%c0_11, %c0_12] : memref<8x16xf32, #tpu.memory_space<vmem>>, vector<8x16xf32>
    tpu.vector_store %arg6[%c0_11, %c0_12], %12 {strides = array<i32>} : memref<8x16xf32, #tpu.memory_space<vmem>>, vector<8x16xf32>,
    return
  }
  func.func @transform_0(%arg0: i32) -> (i32, i32) {
    %c0_i32 = arith.constant 0 : i32
    %c0_i32_0 = arith.constant 0 : i32
    return %arg0, %c0_i32 : i32, i32
  }
  func.func @transform_1(%arg0: i32) -> (i32, i32) {
    %c0_i32 = arith.constant 0 : i32
    %c0_i32_0 = arith.constant 0 : i32
    %c0_i32_1 = arith.constant 0 : i32
    return %c0_i32, %c0_i32_0 : i32, i32
  }
  func.func @transform_2(%arg0: i32) -> (i32, i32) {
    %c0_i32 = arith.constant 0 : i32
    %c0_i32_0 = arith.constant 0 : i32
    %c0_i32_1 = arith.constant 0 : i32
    return %c0_i32, %c0_i32_0 : i32, i32
  }
  func.func @transform_3(%arg0: i32) -> (i32, i32) {
    %c0_i32 = arith.constant 0 : i32
    %c0_i32_0 = arith.constant 0 : i32
    %c0_i32_1 = arith.constant 0 : i32
    return %c0_i32, %c0_i32_0 : i32, i32
  }
  func.func @transform_4(%arg0: i32) -> (i32, i32) {
    %c0_i32 = arith.constant 0 : i32
    %c0_i32_0 = arith.constant 0 : i32
    %c0_i32_1 = arith.constant 0 : i32
    return %c0_i32, %c0_i32_0 : i32, i32
  }
  func.func @transform_5(%arg0: i32) -> (i32, i32) {
    %c0_i32 = arith.constant 0 : i32
    %c0_i32_0 = arith.constant 0 : i32
    return %arg0, %c0_i32 : i32, i32
  }
}

</mosaic_0001>

<bundles_post_ra>
// kernel: tpu_custom_call.1
= control target key start
LH: loop header
LB: loop body
LE: loop exit
PB: predicated region body
PF: predicated region fallthrough
CT: control target
= control target key end

     0   :  { %v356_v1 = vmov 0.0   ;;  %vm357_vm0 = vmmov 0   ;;  %s531_s0 = inlined_call_operand.vmem [shape: f32[8,128], index: 0, kind: input, shape index: {}]   ;;  %s532_s1 = inlined_call_operand.vmem [shape: f32[128,128], index: 1, kind: input, shape index: {}]   ;;  %s533_s2 = inlined_call_operand.vmem [shape: f32[1,128], index: 2, kind: input, shape index: {}]   ;;  %s534_s3 = inlined_call_operand.vmem [shape: f32[128,16], index: 3, kind: input, shape index: {}]   ;;  %s535_s4 = inlined_call_operand.vmem [shape: f32[1,16], index: 4, kind: input, shape index: {}]   ;;  %s536_s5 = inlined_call_operand.hbm [shape: f32[8,16], index: 5, kind: output, shape index: {}]  }
   0x1   :  { %v37_v0 = vld [vmem:[%s532_s1 + $0x78] sm:$0xff]  ;;  %261 = vmatprep.subr.mxu0 %v356_v1  ;;  %v36_v2 = vld [vmem:[%s532_s1 + $0x70] sm:$0xff]  ;;  %293 = vmatprep.mubr.msk.f32.mxu0 %vm357_vm0, %v356_v1  ;;  %v35_v3 = vld [vmem:[%s532_s1 + $0x68] sm:$0xff] }
   0x2   :  { %262 = vmatpush3.msra.mxu0 %v37_v0  ;;  %296 = vmatprep.subr.mxu1 %v356_v1  ;;  %v34_v4 = vld [vmem:[%s532_s1 + $0x60] sm:$0xff]  ;;  %v131_v5 = vld [vmem:[%s534_s3 + $0x78] sm:$0xff]  ;;  %v130_v6 = vld [vmem:[%s534_s3 + $0x70] sm:$0xff] }
   0x3   :  { %263 = vmatprep.subr.mxu0 %v356_v1  ;;  %328 = vmatprep.mubr.msk.f32.mxu1 %vm357_vm0, %v356_v1  ;;  %v33_v7 = vld [vmem:[%s532_s1 + $0x58] sm:$0xff]  ;;  %v129_v8 = vld [vmem:[%s534_s3 + $0x68] sm:$0xff]  ;;  %v32_v9 = vld [vmem:[%s532_s1 + $0x50] sm:$0xff] }
   0x4   :  { %264 = vmatpush3.msra.mxu0 %v36_v2  ;;  %297 = vmatpush3.msra.mxu1 %v131_v5  ;;  %v128_v10 = vld [vmem:[%s534_s3 + $0x60] sm:$0xff] }
   0x5   :  { %265 = vmatprep.subr.mxu0 %v356_v1  ;;  %298 = vmatprep.subr.mxu1 %v356_v1 }
   0x6   :  { %266 = vmatpush3.msra.mxu0 %v35_v3  ;;  %299 = vmatpush3.msra.mxu1 %v130_v6 }
   0x7   :  { %267 = vmatprep.subr.mxu0 %v356_v1  ;;  %300 = vmatprep.subr.mxu1 %v356_v1 }
   0x8   :  { %268 = vmatpush3.msra.mxu0 %v34_v4  ;;  %301 = vmatpush3.msra.mxu1 %v129_v8 }
   0x9   :  { %269 = vmatprep.subr.mxu0 %v356_v1 }
   0xa   :  { %270 = vmatpush3.msra.mxu0 %v33_v7 }
   0xb   :  { %10 = vsyncpa [#allocation3], 0  ;;  %271 = vmatprep.subr.mxu0 %v356_v1  ;;  %v31_v11 = vld [vmem:[%s532_s1 + $0x48] sm:$0xff]  ;;  %302 = vmatprep.subr.mxu1 %v356_v1  ;;  %v127_v12 = vld [vmem:[%s534_s3 + $0x58] sm:$0xff]  ;;  %s358_s11 = smov [#allocation2]   ;;  %vm209_vm1 = vcmask 130048  }
   0xc   :  { %272 = vmatpush3.msra.mxu0 %v32_v9  ;;  %303 = vmatpush3.msra.mxu1 %v128_v10  ;;  %v30_v13 = vld [vmem:[%s532_s1 + $0x40] sm:$0xff]  ;;  %v126_v14 = vld [vmem:[%s534_s3 + $0x50] sm:$0xff]  ;;  %v29_v15 = vld [vmem:[%s532_s1 + $0x38] sm:$0xff]  ;;  %s217_s12 = sshll.u32 %s358_s11, 4  ;;  %s218_s12 = int_to_ptr.vmem [resolvable:$true] %s217_s12 }
   0xd   :  { %273 = vmatprep.subr.mxu0 %v356_v1  ;;  %304 = vmatprep.subr.mxu1 %v356_v1  ;;  %v125_v16 = vld [vmem:[%s534_s3 + $0x48] sm:$0xff]  ;;  %v28_v17 = vld [vmem:[%s532_s1 + $0x30] sm:$0xff]  ;;  %v124_v18 = vld [vmem:[%s534_s3 + $0x40] sm:$0xff]  ;;  %p339_p1 = scmp.lt.s32.totalorder %s218_s12, %s218_s12 }
   0xe   :  { %274 = vmatpush3.msra.mxu0 %v31_v11  ;;  %305 = vmatpush3.msra.mxu1 %v127_v12  ;;  %v27_v19 = vld [vmem:[%s532_s1 + $0x28] sm:$0xff]  ;;  %v123_v20 = vld [vmem:[%s534_s3 + $0x38] sm:$0xff]  ;;  %v26_v21 = vld [vmem:[%s532_s1 + $0x20] sm:$0xff] }
   0xf   :  { %275 = vmatprep.subr.mxu0 %v356_v1  ;;  %306 = vmatprep.subr.mxu1 %v356_v1  ;;  %v122_v22 = vld [vmem:[%s534_s3 + $0x30] sm:$0xff]  ;;  %v25_v23 = vld [vmem:[%s532_s1 + $0x18] sm:$0xff]  ;;  %v121_v24 = vld [vmem:[%s534_s3 + $0x28] sm:$0xff] }
  0x10   :  { %276 = vmatpush3.msra.mxu0 %v30_v13  ;;  %307 = vmatpush3.msra.mxu1 %v126_v14  ;;  %v24_v25 = vld [vmem:[%s532_s1 + $0x10] sm:$0xff]  ;;  %v120_v26 = vld [vmem:[%s534_s3 + $0x20] sm:$0xff]  ;;  %v23_v27 = vld [vmem:[%s532_s1 + $0x8] sm:$0xff] }
  0x11   :  { %277 = vmatprep.subr.mxu0 %v356_v1  ;;  %308 = vmatprep.subr.mxu1 %v356_v1  ;;  %v119_v28 = vld [vmem:[%s534_s3 + $0x18] sm:$0xff]  ;;  %v22_v29 = vld [vmem:[%s532_s1] sm:$0xff]  ;;  %v118_v31 = vld [vmem:[%s534_s3 + $0x10] sm:$0xff] }
  0x12   :  { %278 = vmatpush3.msra.mxu0 %v29_v15  ;;  %309 = vmatpush3.msra.mxu1 %v125_v16  ;;  %v21_v30 = vld [vmem:[%s531_s0] sm:$0xff]  ;;  %v117_v32 = vld [vmem:[%s534_s3 + $0x8] sm:$0xff] }
  0x13   :  { %279 = vmatprep.subr.mxu0 %v356_v1  ;;  %310 = vmatprep.subr.mxu1 %v356_v1  ;;  %v116_v33 = vld [vmem:[%s534_s3] sm:$0xff]  ;;  %s334_s3 = scalar_lea.vmem %s218_s12, 128 }
  0x14   :  { %280 = vmatpush3.msra.mxu0 %v28_v17  ;;  %311 = vmatpush3.msra.mxu1 %v124_v18  ;;  %v225_v34 = vld [vmem:[%s533_s2] ss:$0 sm:$0xff]  ;;  %p335_p0 = scmp.ne.s32.totalorder %s218_s12, %s334_s3  ;;  %p340_p2 = scmp.lt.s32.totalorder %s334_s3, %s334_s3 }
  0x15   :  { %281 = vmatprep.subr.mxu0 %v356_v1  ;;  %312 = vmatprep.subr.mxu1 %v356_v1  ;;  %v226_v39 = vld [vmem:[%s535_s4] ss:$0 sm:$0xff] }
  0x16   :  { %282 = vmatpush3.msra.mxu0 %v27_v19  ;;  %313 = vmatpush3.msra.mxu1 %v123_v20  ;;  %p341_p3 = por %p340_p2, %p339_p1 }
  0x17   :  { %283 = vmatprep.subr.mxu0 %v356_v1  ;;  %314 = vmatprep.subr.mxu1 %v356_v1 }
  0x18   :  { %284 = vmatpush3.msra.mxu0 %v26_v21  ;;  %315 = vmatpush3.msra.mxu1 %v122_v22  ;;  %p342_p4 = pnand %p341_p3, %p335_p0 }
  0x19   :  { %285 = vmatprep.subr.mxu0 %v356_v1  ;;  %316 = vmatprep.subr.mxu1 %v356_v1 }
  0x1a   :  { %286 = vmatpush3.msra.mxu0 %v25_v23  ;;  %317 = vmatpush3.msra.mxu1 %v121_v24 }
  0x1b   :  { %287 = vmatprep.subr.mxu0 %v356_v1  ;;  %318 = vmatprep.subr.mxu1 %v356_v1 }
  0x1c   :  { %288 = vmatpush3.msra.mxu0 %v24_v25  ;;  %319 = vmatpush3.msra.mxu1 %v120_v26 }
  0x1d   :  { %289 = vmatprep.subr.mxu0 %v356_v1  ;;  %320 = vmatprep.subr.mxu1 %v356_v1 }
  0x1e   :  { %290 = vmatpush3.msra.mxu0 %v23_v27  ;;  %321 = vmatpush3.msra.mxu1 %v119_v28 }
  0x1f   :  { %291 = vmatprep.subr.mxu0 %v356_v1  ;;  %322 = vmatprep.subr.mxu1 %v356_v1 }
  0x20   :  { %292 = vmatpush3.msra.mxu0 %v22_v29  ;;  %323 = vmatpush3.msra.mxu1 %v118_v31 }
  0x21   :  { %294 = vmatmul.mubr.f32.vlgmr.msra.gmra.mxu0 %v21_v30  ;;  %324 = vmatprep.subr.mxu1 %v356_v1 }
  0x22   :  { %325 = vmatpush3.msra.mxu1 %v117_v32 }
  0x23   :  { %326 = vmatprep.subr.mxu1 %v356_v1 }
  0x24   :  { %327 = vmatpush3.msra.mxu1 %v116_v33 }
  0xe1   :  { %v111_v35 = vpop.f32.mrf.mxu0 }
  0xe2   :  { %v112_v36 = vadd.f32 %v225_v34, %v111_v35 }
  0xe3   :  { %v295_v37 = vpop.f32.mrf.mxu0 }
  0xe4   :  { %v115_v38 = vmax.f32 %v112_v36, 0.0 }
  0xe6   :  { %329 = vmatmul.mubr.f32.vlgmr.msra.gmra.mxu1 %v115_v38 }
 0x1a6   :  { %v205_v40 = vpop.f32.mrf.mxu1 }
 0x1a7   :  { %v206_v41 = vadd.f32 %v226_v39, %v205_v40 }
 0x1a8   :  { %v330_v42 = vpop.f32.mrf.mxu1 }
 0x1a9   :  { %210 = vst.msk [vmem:[#allocation2] sm:$0xff] %vm209_vm1, %v206_v41 }
 0x1aa   :  { %345 = shalt.err (!%p342_p4)
}
 0x1ab   :  { %220 = dma.vmem_to_hbm [thread:$0]  %s218_s12, 128, %s536_s5, [#allocation3]  }
 0x1ac   :  { %354 = dma.done.wait [#allocation3], 128  }
 0x1ad   :  { %355 = vsyncadd [#allocation3], 4294967168 }
 0x1ae   :  { %224 = vsyncpa [#allocation3], 1 }

</bundles_post_ra>
